<compile_context>
chip_gen: v6e
topology: v6e:2x2x1
jax: 0.10.0
libtpu: 0.0.40
codegen_flags: <defaults>
</compile_context>

<pallas_src>
import jax
import jax.numpy as jnp
from jax.experimental import pallas as pl
from jax.experimental.pallas import tpu as pltpu

EPS = 1e-5
LANE = 128


def _round_up(n, m):
    return ((n + m - 1) // m) * m


def _dense_classifier_kernel(
    x_ref,                      # (TILE_B, C_in)   bf16   (BatchNorm already folded)
    w1_ref, b1_ref,             # (C_in, H1) bf16, (1, H1) f32
    w2_ref, b2_ref,             # (H1, H2)  bf16, (1, H2) f32
    wout_ref, bout_ref,         # (H2, Npad) bf16, (1, Npad) f32
    o_ref,                      # (TILE_B, Npad)  f32
):
    x = x_ref[...]

    # ---- Dense0d hidden layer 1 (Linear -> ReLU), BN folded into w1/b1 ----
    h1 = jnp.dot(x, w1_ref[...], preferred_element_type=jnp.float32) + b1_ref[...]
    h1 = jnp.maximum(h1, 0.0)

    # ---- Dense0d hidden layer 2 (Linear -> ReLU) ----
    h2 = jnp.dot(h1.astype(jnp.bfloat16), w2_ref[...],
                 preferred_element_type=jnp.float32) + b2_ref[...]
    h2 = jnp.maximum(h2, 0.0)

    # ---- Output Linear (logits over lane-padded class dim) ----
    out = jnp.dot(h2.astype(jnp.bfloat16), wout_ref[...],
                  preferred_element_type=jnp.float32) + bout_ref[...]
    o_ref[...] = out.astype(o_ref.dtype)

    # TODO(synk): dropout layers (training only) and the `stacked=True` concatenation
    # variant of Dense0d are not exercised by this inference forward pass.


def _fold_batchnorm(params):
    """Fold inference BatchNorm1d into the first Linear: x@W1'+b1' == bn(x)@W1+b1."""
    scale = params["bn_gamma"] * jax.lax.rsqrt(params["bn_var"] + EPS)   # (1, C)
    shift = params["bn_beta"] - params["bn_mean"] * scale                # (1, C)
    w1f = scale.reshape(-1, 1) * params["w1"]                            # (C, H1)
    b1f = params["b1"] + shift @ params["w1"]                            # (1, H1)
    return w1f, b1f


def dense_classifier_forward(x, params, *, tile_b=512):
    """x: (batch, in_features) f32.  params: dict of kernel operands (f32)."""
    batch, in_features = x.shape
    hidden1 = params["w1"].shape[1]
    hidden2 = params["w2"].shape[1]
    n_classes = params["wout"].shape[1]

    # ---- trace-time parameter preparation ----
    w1f, b1f = _fold_batchnorm(params)

    # Pad the class dimension to a full 128-lane width (zero columns) so the
    # output store is lane-dense; slice logits back afterwards.
    n_pad = _round_up(n_classes, LANE)
    wout_p = jnp.pad(params["wout"], ((0, 0), (0, n_pad - n_classes)))
    bout_p = jnp.pad(params["bout"], ((0, 0), (0, n_pad - n_classes)))

    # bf16 MXU operands, f32 biases / accumulation.
    x_b = x.astype(jnp.bfloat16)
    w1_b = w1f.astype(jnp.bfloat16)
    w2_b = params["w2"].astype(jnp.bfloat16)
    wout_b = wout_p.astype(jnp.bfloat16)
    b1_f = b1f.astype(jnp.float32)
    b2_f = params["b2"].astype(jnp.float32)
    bout_f = bout_p.astype(jnp.float32)

    # ---- batch tiling (pad rows with zeros; extra rows sliced off at the end) ----
    tile_b = min(tile_b, _round_up(batch, 8))        # multiple of 8 sublanes
    b_pad = _round_up(batch, tile_b)
    if b_pad != batch:
        x_b = jnp.pad(x_b, ((0, b_pad - batch), (0, 0)))
    n_tiles = b_pad // tile_b

    def const_spec(arr):
        # Whole-array block, same block every grid step -> stays VMEM-resident.
        return pl.BlockSpec(arr.shape, lambda i: tuple(0 for _ in arr.shape))

    out_padded = pl.pallas_call(
        _dense_classifier_kernel,
        out_shape=jax.ShapeDtypeStruct((b_pad, n_pad), jnp.float32),
        grid=(n_tiles,),
        in_specs=[
            pl.BlockSpec((tile_b, in_features), lambda i: (i, 0)),   # x tile
            const_spec(w1_b), const_spec(b1_f),
            const_spec(w2_b), const_spec(b2_f),
            const_spec(wout_b), const_spec(bout_f),
        ],
        out_specs=pl.BlockSpec((tile_b, n_pad), lambda i: (i, 0)),
        compiler_params=pltpu.CompilerParams(
            dimension_semantics=("parallel",),
        ),
    )(x_b, w1_b, b1_f, w2_b, b2_f, wout_b, bout_f)

    return out_padded[:batch, :n_classes]


def make_params(key, in_features, hidden1, hidden2, n_classes):
    """Deterministic synthetic parameters matching the module's __init__ shapes."""
    ks = jax.random.split(key, 8)
    p = {
        # BatchNorm1d(in_features): running stats + affine
        "bn_mean":  jax.random.normal(ks[0], (1, in_features), jnp.float32) * 0.1,
        "bn_var":   jax.nn.softplus(jax.random.normal(ks[1], (1, in_features), jnp.float32)) + 0.5,
        "bn_gamma": 1.0 + 0.1 * jax.random.normal(ks[2], (1, in_features), jnp.float32),
        "bn_beta":  0.1 * jax.random.normal(ks[3], (1, in_features), jnp.float32),
        # Dense0d hidden layers (Activated0d ~ Linear + ReLU), weights as (in, out)
        "w1": jax.random.normal(ks[4], (in_features, hidden1), jnp.float32) / jnp.sqrt(in_features),
        "b1": jnp.zeros((1, hidden1), jnp.float32),
        "w2": jax.random.normal(ks[5], (hidden1, hidden2), jnp.float32) / jnp.sqrt(hidden1),
        "b2": jnp.zeros((1, hidden2), jnp.float32),
        # Output Linear(hidden2, n_classes)
        "wout": jax.random.normal(ks[6], (hidden2, n_classes), jnp.float32) / jnp.sqrt(hidden2),
        "bout": 0.01 * jax.random.normal(ks[7], (1, n_classes), jnp.float32),
    }
    return p


def reference_forward_f32(x, p):
    """Pure-JAX f32 reference of the original module forward (BN -> [Lin,ReLU]x2 -> Lin)."""
    xn = (x - p["bn_mean"]) * jax.lax.rsqrt(p["bn_var"] + EPS) * p["bn_gamma"] + p["bn_beta"]
    h1 = jnp.maximum(xn @ p["w1"] + p["b1"], 0.0)
    h2 = jnp.maximum(h1 @ p["w2"] + p["b2"], 0.0)
    return h2 @ p["wout"] + p["bout"]


def reference_forward_bf16(x, p):
    """Pure-JAX reference matching the kernel's bf16-MXU / f32-accumulate arithmetic."""
    w1f, b1f = _fold_batchnorm(p)
    def mm(a, w):
        return jnp.dot(a.astype(jnp.bfloat16), w.astype(jnp.bfloat16),
                       preferred_element_type=jnp.float32)
    h1 = jnp.maximum(mm(x, w1f) + b1f, 0.0)
    h2 = jnp.maximum(mm(h1, p["w2"]) + p["b2"], 0.0)
    return mm(h2, p["wout"]) + p["bout"]


if __name__ == "__main__":
    # Small shapes consistent with the module:
    #   len(inputs)=16 features, hidden_layers=[{"channels":32},{"channels":32}],
    #   len(classes)=8, batch=8.
    batch, in_features, hidden1, hidden2, n_classes = 8, 16, 32, 32, 8

    key = jax.random.PRNGKey(0)
    kx, kp = jax.random.split(key)
    x = jax.random.normal(kx, (batch, in_features), jnp.float32)
    params = make_params(kp, in_features, hidden1, hidden2, n_classes)

    out = dense_classifier_forward(x, params)
    out = jax.block_until_ready(out)
    assert out.shape == (batch, n_classes)

    # Tight check against a reference using the same bf16-MXU/f32-accumulate arithmetic.
    ref_bf16 = reference_forward_bf16(x, params)
    assert jnp.allclose(out, ref_bf16, atol=1e-3, rtol=1e-3), "mismatch vs bf16 reference"

    # Loose check against the exact f32 module semantics (bf16 MXU rounding only).
    ref_f32 = reference_forward_f32(x, params)
    assert jnp.allclose(out, ref_f32, atol=1e-1, rtol=1e-1), "mismatch vs f32 reference"

    print("KERNEL_OK")
</pallas_src>

<mosaic_0001>
module attributes {stable_mosaic.version = 11 : i64} {
  func.func @_dense_classifier_kernel(%arg0: i32, %arg1: memref<8x16xbf16, #tpu.memory_space<vmem>>, %arg2: memref<16x32xbf16, #tpu.memory_space<vmem>>, %arg3: memref<1x32xf32, #tpu.memory_space<vmem>>, %arg4: memref<32x32xbf16, #tpu.memory_space<vmem>>, %arg5: memref<1x32xf32, #tpu.memory_space<vmem>>, %arg6: memref<32x128xbf16, #tpu.memory_space<vmem>>, %arg7: memref<1x128xf32, #tpu.memory_space<vmem>>, %arg8: memref<8x128xf32, #tpu.memory_space<vmem>>) attributes {dimension_semantics = [#tpu.dimension_semantics<parallel>], iteration_bounds = array<i64: 1>, scalar_prefetch = 0 : i64, scratch_operands = 0 : i64, tpu.core_type = #tpu.core_type<tc>, window_params = [{transform_indices = @transform_0, window_bounds = array<i64: 8, 16>}, {pipeline_mode = #tpu.pipeline_mode<synchronous>, transform_indices = @transform_1, window_bounds = array<i64: 16, 32>}, {pipeline_mode = #tpu.pipeline_mode<synchronous>, transform_indices = @transform_2, window_bounds = array<i64: 1, 32>}, {pipeline_mode = #tpu.pipeline_mode<synchronous>, transform_indices = @transform_3, window_bounds = array<i64: 32, 32>}, {pipeline_mode = #tpu.pipeline_mode<synchronous>, transform_indices = @transform_4, window_bounds = array<i64: 1, 32>}, {pipeline_mode = #tpu.pipeline_mode<synchronous>, transform_indices = @transform_5, window_bounds = array<i64: 32, 128>}, {pipeline_mode = #tpu.pipeline_mode<synchronous>, transform_indices = @transform_6, window_bounds = array<i64: 1, 128>}, {transform_indices = @transform_7, window_bounds = array<i64: 8, 128>}]} {
    %c0 = arith.constant 0 : index
    %c0_0 = arith.constant 0 : index
    %0 = vector.load %arg1[%c0, %c0_0] : memref<8x16xbf16, #tpu.memory_space<vmem>>, vector<8x16xbf16>
    %c0_1 = arith.constant 0 : index
    %c0_2 = arith.constant 0 : index
    %1 = vector.load %arg2[%c0_1, %c0_2] : memref<16x32xbf16, #tpu.memory_space<vmem>>, vector<16x32xbf16>
    %cst = arith.constant dense<0.000000e+00> : vector<8x32xf32>
    %2 = tpu.matmul %0, %1, %cst {dimension_numbers = #tpu.dot_dimension_numbers<[1], [0], [0], [1], [0, 0, 1, 1], [], []>} : vector<8x16xbf16>, vector<16x32xbf16>, vector<8x32xf32> -> vector<8x32xf32>
    %c0_3 = arith.constant 0 : index
    %c0_4 = arith.constant 0 : index
    %3 = vector.load %arg3[%c0_3, %c0_4] : memref<1x32xf32, #tpu.memory_space<vmem>>, vector<1x32xf32>
    %4 = vector.broadcast %3 : vector<1x32xf32> to vector<8x32xf32>
    %5 = arith.addf %2, %4 : vector<8x32xf32>
    %cst_5 = arith.constant 0.000000e+00 : f32
    %6 = vector.broadcast %cst_5 : f32 to vector<8x32xf32>
    %7 = arith.maximumf %5, %6 : vector<8x32xf32>
    %8 = arith.truncf %7 : vector<8x32xf32> to vector<8x32xbf16>
    %c0_6 = arith.constant 0 : index
    %c0_7 = arith.constant 0 : index
    %9 = vector.load %arg4[%c0_6, %c0_7] : memref<32x32xbf16, #tpu.memory_space<vmem>>, vector<32x32xbf16>
    %cst_8 = arith.constant dense<0.000000e+00> : vector<8x32xf32>
    %10 = tpu.matmul %8, %9, %cst_8 {dimension_numbers = #tpu.dot_dimension_numbers<[1], [0], [0], [1], [0, 0, 1, 1], [], []>} : vector<8x32xbf16>, vector<32x32xbf16>, vector<8x32xf32> -> vector<8x32xf32>
    %c0_9 = arith.constant 0 : index
    %c0_10 = arith.constant 0 : index
    %11 = vector.load %arg5[%c0_9, %c0_10] : memref<1x32xf32, #tpu.memory_space<vmem>>, vector<1x32xf32>
    %12 = vector.broadcast %11 : vector<1x32xf32> to vector<8x32xf32>
    %13 = arith.addf %10, %12 : vector<8x32xf32>
    %cst_11 = arith.constant 0.000000e+00 : f32
    %14 = vector.broadcast %cst_11 : f32 to vector<8x32xf32>
    %15 = arith.maximumf %13, %14 : vector<8x32xf32>
    %16 = arith.truncf %15 : vector<8x32xf32> to vector<8x32xbf16>
    %c0_12 = arith.constant 0 : index
    %c0_13 = arith.constant 0 : index
    %17 = vector.load %arg6[%c0_12, %c0_13] : memref<32x128xbf16, #tpu.memory_space<vmem>>, vector<32x128xbf16>
    %cst_14 = arith.constant dense<0.000000e+00> : vector<8x128xf32>
    %18 = tpu.matmul %16, %17, %cst_14 {dimension_numbers = #tpu.dot_dimension_numbers<[1], [0], [0], [1], [0, 0, 1, 1], [], []>} : vector<8x32xbf16>, vector<32x128xbf16>, vector<8x128xf32> -> vector<8x128xf32>
    %c0_15 = arith.constant 0 : index
    %c0_16 = arith.constant 0 : index
    %19 = vector.load %arg7[%c0_15, %c0_16] : memref<1x128xf32, #tpu.memory_space<vmem>>, vector<1x128xf32>
    %20 = vector.broadcast %19 : vector<1x128xf32> to vector<8x128xf32>
    %21 = arith.addf %18, %20 : vector<8x128xf32>
    %c0_17 = arith.constant 0 : index
    %c0_18 = arith.constant 0 : index
    %22 = vector.load %arg8[%c0_17, %c0_18] : memref<8x128xf32, #tpu.memory_space<vmem>>, vector<8x128xf32>
    tpu.vector_store %arg8[%c0_17, %c0_18], %21 {strides = array<i32>} : memref<8x128xf32, #tpu.memory_space<vmem>>, vector<8x128xf32>,
    return
  }
  func.func @transform_0(%arg0: i32) -> (i32, i32) {
    %c0_i32 = arith.constant 0 : i32
    %c0_i32_0 = arith.constant 0 : i32
    return %arg0, %c0_i32 : i32, i32
  }
  func.func @transform_1(%arg0: i32) -> (i32, i32) {
    %c0_i32 = arith.constant 0 : i32
    %c0_i32_0 = arith.constant 0 : i32
    %c0_i32_1 = arith.constant 0 : i32
    return %c0_i32, %c0_i32_0 : i32, i32
  }
  func.func @transform_2(%arg0: i32) -> (i32, i32) {
    %c0_i32 = arith.constant 0 : i32
    %c0_i32_0 = arith.constant 0 : i32
    %c0_i32_1 = arith.constant 0 : i32
    return %c0_i32, %c0_i32_0 : i32, i32
  }
  func.func @transform_3(%arg0: i32) -> (i32, i32) {
    %c0_i32 = arith.constant 0 : i32
    %c0_i32_0 = arith.constant 0 : i32
    %c0_i32_1 = arith.constant 0 : i32
    return %c0_i32, %c0_i32_0 : i32, i32
  }
  func.func @transform_4(%arg0: i32) -> (i32, i32) {
    %c0_i32 = arith.constant 0 : i32
    %c0_i32_0 = arith.constant 0 : i32
    %c0_i32_1 = arith.constant 0 : i32
    return %c0_i32, %c0_i32_0 : i32, i32
  }
  func.func @transform_5(%arg0: i32) -> (i32, i32) {
    %c0_i32 = arith.constant 0 : i32
    %c0_i32_0 = arith.constant 0 : i32
    %c0_i32_1 = arith.constant 0 : i32
    return %c0_i32, %c0_i32_0 : i32, i32
  }
  func.func @transform_6(%arg0: i32) -> (i32, i32) {
    %c0_i32 = arith.constant 0 : i32
    %c0_i32_0 = arith.constant 0 : i32
    %c0_i32_1 = arith.constant 0 : i32
    return %c0_i32, %c0_i32_0 : i32, i32
  }
  func.func @transform_7(%arg0: i32) -> (i32, i32) {
    %c0_i32 = arith.constant 0 : i32
    %c0_i32_0 = arith.constant 0 : i32
    return %arg0, %c0_i32 : i32, i32
  }
}

</mosaic_0001>

<bundles_post_ra>
// kernel: tpu_custom_call.1
= control target key start
LH: loop header
LB: loop body
LE: loop exit
PB: predicated region body
PF: predicated region fallthrough
CT: control target
= control target key end

     0   :  { %12 = vsyncpa [#allocation3], 0  ;;  %s541_s0 = inlined_call_operand.hbm [shape: bf16[8,16], index: 0, kind: input, shape index: {}]   ;;  %s542_s1 = inlined_call_operand.hbm [shape: bf16[16,32], index: 1, kind: input, shape index: {}]   ;;  %s543_s2 = inlined_call_operand.vmem [shape: f32[1,32], index: 2, kind: input, shape index: {}]   ;;  %s544_s3 = inlined_call_operand.hbm [shape: bf16[32,32], index: 3, kind: input, shape index: {}]   ;;  %s545_s4 = inlined_call_operand.vmem [shape: f32[1,32], index: 4, kind: input, shape index: {}]   ;;  %s546_s5 = inlined_call_operand.hbm [shape: bf16[32,128], index: 5, kind: input, shape index: {}]   ;;  %s547_s6 = inlined_call_operand.vmem [shape: f32[1,128], index: 6, kind: input, shape index: {}]   ;;  %s548_s7 = inlined_call_operand.hbm [shape: f32[8,128], index: 7, kind: output, shape index: {}]  }
   0x1   :  { %13 = vsyncpa [#allocation6], 0 }
   0x2   :  { %14 = vsyncpa [#allocation9], 0 }
   0x3   :  { %15 = vsyncpa [#allocation4], 0  ;;  %s459_s24 = smov [#allocation5]  }
   0x4   :  { %s31_s25 = sshll.u32 %s459_s24, 4  ;;  %s32_s25 = int_to_ptr.vmem [resolvable:$true] %s31_s25 }
   0x5   :  { %s359_s26 = scalar_lea.vmem %s32_s25, 128  ;;  %p364_p1 = scmp.lt.s32.totalorder %s32_s25, %s32_s25 }
   0x6   :  { %p360_p0 = scmp.ne.s32.totalorder %s32_s25, %s359_s26  ;;  %p365_p2 = scmp.lt.s32.totalorder %s359_s26, %s359_s26 }
   0x8   :  { %p366_p3 = por %p365_p2, %p364_p1 }
   0xa   :  { %p367_p4 = pnand %p366_p3, %p360_p0 }
   0xc   :  { %370 = shalt.err (!%p367_p4)
}
   0xd   :  { %s460_s27 = smov 64   ;;  %s461_s28 = smov 4  }
   0xe   :  { %37 = dma.hbm_to_vmem [thread:$0]  %s542_s1, 128, %s32_s25, [#allocation6], %s460_s27, %s460_s27, %s461_s28  }
   0xf   :  { %s462_s8 = smov [#allocation2]   ;;  %s463_s10 = smov [#allocation7]  }
  0x10   :  { %s22_s9 = sshll.u32 %s462_s8, 4  ;;  %s45_s11 = sshll.u32 %s463_s10, 4  ;;  %s23_s9 = int_to_ptr.vmem [resolvable:$true] %s22_s9  ;;  %s46_s11 = int_to_ptr.vmem [resolvable:$true] %s45_s11 }
  0x11   :  { %s379_s12 = scalar_lea.vmem %s23_s9, 64  ;;  %p384_p6 = scmp.lt.s32.totalorder %s23_s9, %s23_s9 }
  0x12   :  { %p380_p5 = scmp.ne.s32.totalorder %s23_s9, %s379_s12  ;;  %p385_p7 = scmp.lt.s32.totalorder %s379_s12, %s379_s12 }
  0x14   :  { %p386_p8 = por %p385_p7, %p384_p6 }
  0x16   :  { %p387_p9 = pnand %p386_p8, %p380_p5 }
  0x18   :  { %390 = shalt.err (!%p387_p9)
}
  0x19   :  { %25 = dma.hbm_to_vmem [thread:$0]  %s541_s0, 64, %s23_s9, [#allocation3]  }
  0x1a   :  { %s399_s15 = scalar_lea.vmem %s46_s11, 256  ;;  %p404_p11 = scmp.lt.s32.totalorder %s46_s11, %s46_s11 }
  0x1b   :  { %p400_p10 = scmp.ne.s32.totalorder %s46_s11, %s399_s15  ;;  %p405_p12 = scmp.lt.s32.totalorder %s399_s15, %s399_s15 }
  0x1d   :  { %p406_p13 = por %p405_p12, %p404_p11 }
  0x1f   :  { %p407_p0 = pnand %p406_p13, %p400_p10 }
  0x21   :  { %410 = shalt.err (!%p407_p0)
}
  0x22   :  { %51 = dma.hbm_to_vmem [thread:$0]  %s544_s3, 256, %s46_s11, [#allocation6], %s460_s27, %s460_s27, %s461_s28  }
  0x23   :  { %s464_s17 = smov [#allocation8]  }
  0x24   :  { %s59_s18 = sshll.u32 %s464_s17, 4  ;;  %s60_s18 = int_to_ptr.vmem [resolvable:$true] %s59_s18 }
  0x25   :  { %s419_s19 = scalar_lea.vmem %s60_s18, 256  ;;  %p424_p2 = scmp.lt.s32.totalorder %s60_s18, %s60_s18 }
  0x26   :  { %p420_p1 = scmp.ne.s32.totalorder %s60_s18, %s419_s19  ;;  %p425_p3 = scmp.lt.s32.totalorder %s419_s19, %s419_s19 }
  0x28   :  { %p426_p4 = por %p425_p3, %p424_p2 }
  0x2a   :  { %p427_p5 = pnand %p426_p4, %p420_p1 }
  0x2c   :  { %430 = shalt.err (!%p427_p5)
}
  0x2d   :  { %65 = dma.hbm_to_vmem [thread:$0]  %s546_s5, 256, %s60_s18, [#allocation9], %s460_s27, %s460_s27, %s461_s28  }
  0x2e   :  { %451 = dma.done.wait [#allocation3], 64  }
  0x2f   :  { %452 = vsyncadd [#allocation3], 4294967232 }
  0x30   :  { %453 = dma.done.wait [#allocation6], 384  }
  0x31   :  { %454 = vsyncadd [#allocation6], 4294966912 }
  0x32   :  { %455 = dma.done.wait [#allocation9], 256  }
  0x33   :  { %456 = vsyncadd [#allocation9], 4294967040  ;;  %v465_v0 = vmov 0.0   ;;  %vm466_vm0 = vmmov 0   ;;  %v346_v1 = vld [vmem:[#allocation5] sm:$0xff]   ;;  %vm97_vm1 = vcmask 130048  }
  0x34   :  { %315 = vmatprep.subr.bf16.mxu0 %v465_v0  ;;  %317 = vmatprep.mubr.msk.bf16.mxu0 %vm466_vm0, %v465_v0  ;;  %v81_v2 = vld [vmem:[#allocation2] sm:$0xf]  ;;  %v347_v3 = vld [vmem:[#allocation7 + $0x8] sm:$0xff]   ;;  %v348_v4 = vld [vmem:[#allocation7] sm:$0xff]   ;;  %vm166_vm2 = vcmask 261120   ;;  %s467_s24 = smov [#allocation10]  }
  0x35   :  { %321 = vmatprep.subr.bf16.mxu1 %v465_v0  ;;  %325 = vmatprep.mubr.msk.bf16.mxu1 %vm466_vm0, %v465_v0  ;;  %v349_v5 = vld [vmem:[#allocation8 + $0x8] sm:$0xff]   ;;  %v296_v6 = vld [vmem:[%s543_s2] ss:$0 sm:$0xff]  ;;  %s285_s25 = sshll.u32 %s467_s24, 4  ;;  %s286_s25 = int_to_ptr.vmem [resolvable:$true] %s285_s25 }
  0x36   :  { %316 = vmatpush3.bf16.msra.mxu0 %v346_v1  ;;  %322 = vmatpush3.bf16.msra.mxu1 %v347_v3  ;;  %v350_v14 = vld [vmem:[#allocation8] sm:$0xff]   ;;  %p436_p7 = scmp.lt.s32.totalorder %s286_s25, %s286_s25 }
  0x37   :  { %329 = vmatprep.subr.bf16.mxu0 %v465_v0  ;;  %323 = vmatprep.subr.bf16.mxu1 %v465_v0  ;;  %v299_v15 = vld [vmem:[%s545_s4] ss:$0 sm:$0xff]  ;;  %s431_s4 = scalar_lea.vmem %s286_s25, 128 }
  0x38   :  { %v303_v23 = vld [vmem:[%s547_s6] ss:$0 sm:$0xff]  ;;  %p432_p6 = scmp.ne.s32.totalorder %s286_s25, %s431_s4  ;;  %p437_p8 = scmp.lt.s32.totalorder %s431_s4, %s431_s4 }
  0x39   :  { %318 = vmatmul.mubr.msk.bf16.vlgmr.msra.gmra.mxu0 %vm97_vm1, %v81_v2 }
  0x3a   :  { %333 = vmatprep.mubr.msk.bf16.mxu0 %vm466_vm0, %v465_v0  ;;  %324 = vmatpush3.bf16.msra.mxu1 %v348_v4  ;;  %p438_p9 = por %p437_p8, %p436_p7 }
  0x3b   :  { %330 = vmatpush3.bf16.msra.mxu0 %v349_v5 }
  0x3c   :  { %331 = vmatprep.subr.bf16.mxu0 %v465_v0  ;;  %p439_p10 = pnand %p438_p9, %p432_p6 }
  0x3f   :  { %332 = vmatpush3.bf16.msra.mxu0 %v350_v14 }
  0xf9   :  { %v135_v7 = vpop.f32.mrf.mxu0 }
  0xfa   :  { %v136_v8 = vadd.f32 %v296_v6, %v135_v7 }
  0xfb   :  { %v319_v9 = vpop.f32.mrf.mxu0 }
  0xfc   :  { %v141_v10 = vmax.f32 %v136_v8, 0.0 }
  0xfd   :  { %v138_v11 = vpop.f32.mrf.mxu0 }
  0xfe   :  { %v142_v12 = vpack.c.bf16 %v141_v10, %v141_v10 }
  0xff   :  { %v320_v13 = vpop.f32.mrf.mxu0 }
 0x100   :  { %326 = vmatmul.mubr.msk.bf16.vlgmr.msra.gmra.mxu1 %vm166_vm2, %v142_v12 }
 0x1c0   :  { %v204_v16 = vpop.f32.mrf.mxu1 }
 0x1c1   :  { %v205_v17 = vadd.f32 %v299_v15, %v204_v16 }
 0x1c2   :  { %v327_v18 = vpop.f32.mrf.mxu1 }
 0x1c3   :  { %v210_v19 = vmax.f32 %v205_v17, 0.0 }
 0x1c4   :  { %v207_v20 = vpop.f32.mrf.mxu1 }
 0x1c5   :  { %v211_v21 = vpack.c.bf16 %v210_v19, %v210_v19 }
 0x1c6   :  { %v328_v22 = vpop.f32.mrf.mxu1 }
 0x1c7   :  { %334 = vmatmul.mubr.msk.bf16.vlgmr.msra.gmra.mxu0 %vm166_vm2, %v211_v21 }
 0x287   :  { %v272_v24 = vpop.f32.mrf.mxu0 }
 0x288   :  { %v273_v25 = vadd.f32 %v303_v23, %v272_v24 }
 0x289   :  { %v335_v26 = vpop.f32.mrf.mxu0 }
 0x28a   :  { %278 = vst [vmem:[#allocation10] sm:$0xff] %v273_v25 }
 0x28b   :  { %v275_v27 = vpop.f32.mrf.mxu0 }
 0x28c   :  { %442 = shalt.err (!%p439_p10)
}
 0x28d   :  { %288 = dma.vmem_to_hbm [thread:$0]  %s286_s25, 128, %s548_s7, [#allocation4]   ;;  %v336_v28 = vpop.f32.mrf.mxu0 }
 0x28e   :  { %457 = dma.done.wait [#allocation4], 128  }
 0x28f   :  { %458 = vsyncadd [#allocation4], 4294967168 }
 0x290   :  { %292 = vsyncpa [#allocation3], 1 }
 0x291   :  { %293 = vsyncpa [#allocation6], 1 }
 0x292   :  { %294 = vsyncpa [#allocation9], 1 }
 0x293   :  { %295 = vsyncpa [#allocation4], 1 }

</bundles_post_ra>
